<compile_context>
chip_gen: v6e
topology: v6e:2x2x1
jax: 0.10.0
libtpu: 0.0.40
codegen_flags: <defaults>
</compile_context>

<pallas_src>
import jax
import jax.numpy as jnp
from jax.experimental import pallas as pl
from jax.experimental.pallas import tpu as pltpu

NUM_CHAMPIONS = 64               # synthetic champion-pool size
NUM_SLOTS = 10                   # champion-id columns used by the model
K1 = NUM_SLOTS * NUM_CHAMPIONS   # 640 = 5 * 128 (lane-aligned contraction dim)
H1, H2 = 64, 32                  # MLP hidden sizes (from the module definition)
_LANE = 128


def _lol_onehot_mlp_kernel(ids_ref, band_ref, w1t_ref, b1_ref, w2t_ref, b2_ref,
                           w3c_ref, b3_ref, o_ref, oh_ref):
    """Feature-major forward: every activation is (features, batch_tile)."""
    # --- one-hot (640, tb) in bf16, built in ONE pass (no RMW accumulator) ----
    band = band_ref[...]                                    # (64, 1) int32 0..63
    for s in range(NUM_SLOTS):
        row = ids_ref[s:s + 1, :]                           # (1, tb) int32
        oh_ref[s * NUM_CHAMPIONS:(s + 1) * NUM_CHAMPIONS, :] = (
            band == row).astype(jnp.bfloat16)               # (64, tb), written once

    # --- Linear(640, 64) + ReLU : native bf16 MXU matmul, f32 accumulation ----
    h1 = jnp.dot(w1t_ref[...], oh_ref[...], preferred_element_type=jnp.float32)
    h1 = jnp.maximum(h1 + b1_ref[...], 0.0)                 # (64, tb)

    # --- Linear(64, 32) + ReLU -------------------------------------------------
    h2 = jnp.dot(w2t_ref[...], h1, preferred_element_type=jnp.float32)
    h2 = jnp.maximum(h2 + b2_ref[...], 0.0)                 # (32, tb)

    # --- Linear(32, 1) + Sigmoid : VPU multiply + sublane reduce, lane-dense ---
    logits = jnp.sum(h2 * w3c_ref[...], axis=0, keepdims=True) + b3_ref[...]
    o_ref[...] = jax.nn.sigmoid(logits)                     # (1, tb)


def _round_up(n, m):
    return ((n + m - 1) // m) * m


def _choose_tiling(batch):
    """Per-generation batch tile + VMEM budget (v5e/v6e: 128 MiB, v7x: 64 MiB/TC)."""
    vmem_bytes = 64 << 20
    try:
        vmem_bytes = int(getattr(pltpu.get_tpu_info(), "vmem_capacity_bytes",
                                 vmem_bytes))
    except Exception:
        pass
    big_vmem = vmem_bytes >= (100 << 20)
    tb_max = 4096 if big_vmem else 2048
    vmem_limit = (64 << 20) if big_vmem else (32 << 20)

    b_aligned = _round_up(batch, _LANE)
    n_steps = max(1, pl.cdiv(b_aligned, tb_max))
    # Give the "parallel" batch axis >= 2 steps (both v7x TensorCores) when that
    # does not add any extra padding over the lane-alignment minimum.
    if n_steps == 1 and _round_up(pl.cdiv(batch, 2), _LANE) * 2 <= b_aligned:
        n_steps = 2
    tb = _round_up(pl.cdiv(batch, n_steps), _LANE)
    return tb, tb * n_steps, n_steps, vmem_limit


def lol_champion_model_onehot(x, params):
    """x: (B, F>=10) float32 with champion ids in the first 10 columns -> (B, 1)."""
    w1, b1, w2, b2, w3, b3 = params
    B = x.shape[0]
    tb, Bp, n_steps, vmem_limit = _choose_tiling(B)

    # float -> int (trunc) -> clamp done once here; only the 10 id columns travel
    # HBM -> VMEM, transposed so the batch is the lane dimension.
    ids = jnp.clip(x[:, :NUM_SLOTS].astype(jnp.int32), 0, NUM_CHAMPIONS - 1)
    ids_t = jnp.pad(ids.T, ((0, 0), (0, Bp - B)))           # (10, Bp) int32

    band = jnp.arange(NUM_CHAMPIONS, dtype=jnp.int32).reshape(NUM_CHAMPIONS, 1)

    # Feature-major weights; W1 in bf16 for the bf16 MXU path (one-hot is exact
    # in bf16, the weight rounding perturbs the output only at the ~1e-3 level).
    w1t = w1.T.astype(jnp.bfloat16)                         # (64, 640)
    b1c = b1.reshape(H1, 1).astype(jnp.float32)
    w2t = w2.T.astype(jnp.float32)                          # (32, 64)
    b2c = b2.reshape(H2, 1).astype(jnp.float32)
    w3c = w3.reshape(H2, 1).astype(jnp.float32)             # (32, 1)
    b3c = b3.reshape(1, 1).astype(jnp.float32)

    cost = pl.CostEstimate(
        flops=2 * Bp * (K1 * H1 + H1 * H2 + H2),
        transcendentals=Bp,                                 # one sigmoid per row
        bytes_accessed=(4 * Bp * (NUM_SLOTS + 1)            # ids in, probs out
                        + 2 * K1 * H1                       # bf16 W1
                        + 4 * (H1 * H2 + H2 + H1 + H2 + 1)),
    )

    out = pl.pallas_call(
        _lol_onehot_mlp_kernel,
        out_shape=jax.ShapeDtypeStruct((1, Bp), jnp.float32),
        grid_spec=pltpu.PrefetchScalarGridSpec(
            num_scalar_prefetch=0,
            grid=(n_steps,),
            in_specs=[
                pl.BlockSpec((NUM_SLOTS, tb), lambda i: (0, i)),     # ids tile
                pl.BlockSpec((NUM_CHAMPIONS, 1), lambda i: (0, 0)),  # band column
                pl.BlockSpec((H1, K1), lambda i: (0, 0)),            # W1^T resident
                pl.BlockSpec((H1, 1), lambda i: (0, 0)),             # b1
                pl.BlockSpec((H2, H1), lambda i: (0, 0)),            # W2^T
                pl.BlockSpec((H2, 1), lambda i: (0, 0)),             # b2
                pl.BlockSpec((H2, 1), lambda i: (0, 0)),             # w3 column
                pl.BlockSpec((1, 1), lambda i: (0, 0)),              # b3
            ],
            out_specs=pl.BlockSpec((1, tb), lambda i: (0, i)),       # lane-dense
            scratch_shapes=[pltpu.VMEM((K1, tb), jnp.bfloat16)],     # one-hot
        ),
        compiler_params=pltpu.CompilerParams(
            dimension_semantics=("parallel",),
            vmem_limit_bytes=vmem_limit,
        ),
        cost_estimate=cost,
    )(ids_t, band, w1t, b1c, w2t, b2c, w3c, b3c)

    return out[0, :B].reshape(B, 1)


def init_params(key):
    """Deterministic synthetic weights; layout (in_features, out_features)."""
    k1, k2, k3 = jax.random.split(key, 3)
    w1 = jax.random.normal(k1, (K1, H1), jnp.float32) * (1.0 / jnp.sqrt(K1))
    b1 = jnp.zeros((H1,), jnp.float32)
    w2 = jax.random.normal(k2, (H1, H2), jnp.float32) * (1.0 / jnp.sqrt(H1))
    b2 = jnp.zeros((H2,), jnp.float32)
    w3 = jax.random.normal(k3, (H2, 1), jnp.float32) * (1.0 / jnp.sqrt(H2))
    b3 = jnp.zeros((1,), jnp.float32)
    return (w1, b1, w2, b2, w3, b3)


def reference_forward(x, params):
    """Pure-JAX f32 reference mirroring the PyTorch module."""
    w1, b1, w2, b2, w3, b3 = params
    ids = jnp.clip(x[:, :NUM_SLOTS].astype(jnp.int32), 0, NUM_CHAMPIONS - 1)
    one_hot = jax.nn.one_hot(ids, NUM_CHAMPIONS, dtype=jnp.float32)
    flat = one_hot.reshape(x.shape[0], -1)
    h1 = jax.nn.relu(flat @ w1 + b1)
    h2 = jax.nn.relu(h1 @ w2 + b2)
    return jax.nn.sigmoid(h2 @ w3 + b3)


if __name__ == "__main__":
    key = jax.random.PRNGKey(0)
    kp, kx = jax.random.split(key)

    params = init_params(kp)

    B, F = 8, 12   # first 10 columns carry champion ids, trailing columns ignored
    champ_ids = jax.random.randint(kx, (B, NUM_SLOTS), 0, NUM_CHAMPIONS)
    x = jnp.concatenate(
        [champ_ids.astype(jnp.float32), jnp.zeros((B, F - NUM_SLOTS), jnp.float32)],
        axis=1)

    out = jax.block_until_ready(lol_champion_model_onehot(x, params))
    ref = reference_forward(x, params)

    assert out.shape == (B, 1)
    # W1 is consumed in bf16 on the MXU; tolerance covers that rounding only.
    assert jnp.max(jnp.abs(out - ref)) < 2e-2
    print("KERNEL_OK")
</pallas_src>

<mosaic_0001>
module attributes {stable_mosaic.version = 11 : i64} {
  func.func @_lol_onehot_mlp_kernel(%arg0: i32, %arg1: memref<10x128xi32, #tpu.memory_space<vmem>>, %arg2: memref<64x1xi32, #tpu.memory_space<vmem>>, %arg3: memref<64x640xbf16, #tpu.memory_space<vmem>>, %arg4: memref<64x1xf32, #tpu.memory_space<vmem>>, %arg5: memref<32x64xf32, #tpu.memory_space<vmem>>, %arg6: memref<32x1xf32, #tpu.memory_space<vmem>>, %arg7: memref<32x1xf32, #tpu.memory_space<vmem>>, %arg8: memref<1x1xf32, #tpu.memory_space<vmem>>, %arg9: memref<1x128xf32, #tpu.memory_space<vmem>>, %arg10: memref<640x128xbf16, #tpu.memory_space<vmem>>) attributes {dimension_semantics = [#tpu.dimension_semantics<parallel>], iteration_bounds = array<i64: 1>, scalar_prefetch = 0 : i64, scratch_operands = 1 : i64, tpu.core_type = #tpu.core_type<tc>, window_params = [{transform_indices = @transform_0, window_bounds = array<i64: 10, 128>}, {pipeline_mode = #tpu.pipeline_mode<synchronous>, transform_indices = @transform_1, window_bounds = array<i64: 64, 1>}, {pipeline_mode = #tpu.pipeline_mode<synchronous>, transform_indices = @transform_2, window_bounds = array<i64: 64, 640>}, {pipeline_mode = #tpu.pipeline_mode<synchronous>, transform_indices = @transform_3, window_bounds = array<i64: 64, 1>}, {pipeline_mode = #tpu.pipeline_mode<synchronous>, transform_indices = @transform_4, window_bounds = array<i64: 32, 64>}, {pipeline_mode = #tpu.pipeline_mode<synchronous>, transform_indices = @transform_5, window_bounds = array<i64: 32, 1>}, {pipeline_mode = #tpu.pipeline_mode<synchronous>, transform_indices = @transform_6, window_bounds = array<i64: 32, 1>}, {pipeline_mode = #tpu.pipeline_mode<synchronous>, transform_indices = @transform_7, window_bounds = array<i64: 1, 1>}, {transform_indices = @transform_8, window_bounds = array<i64: 1, 128>}]} {
    %c0 = arith.constant 0 : index
    %c0_0 = arith.constant 0 : index
    %0 = vector.load %arg2[%c0, %c0_0] : memref<64x1xi32, #tpu.memory_space<vmem>>, vector<64x1xi32>
    %c0_1 = arith.constant 0 : index
    %c0_2 = arith.constant 0 : index
    %1 = vector.load %arg1[%c0_1, %c0_2] : memref<10x128xi32, #tpu.memory_space<vmem>>, vector<1x128xi32>
    %2 = vector.broadcast %0 : vector<64x1xi32> to vector<64x128xi32>
    %3 = vector.broadcast %1 : vector<1x128xi32> to vector<64x128xi32>
    %4 = arith.cmpi eq, %2, %3 : vector<64x128xi32>
    %5 = arith.extui %4 : vector<64x128xi1> to vector<64x128xi32>
    %6 = arith.sitofp %5 : vector<64x128xi32> to vector<64x128xf32>
    %7 = arith.truncf %6 : vector<64x128xf32> to vector<64x128xbf16>
    %c0_3 = arith.constant 0 : index
    %c0_4 = arith.constant 0 : index
    %8 = vector.load %arg10[%c0_3, %c0_4] : memref<640x128xbf16, #tpu.memory_space<vmem>>, vector<64x128xbf16>
    tpu.vector_store %arg10[%c0_3, %c0_4], %7 {strides = array<i32>} : memref<640x128xbf16, #tpu.memory_space<vmem>>, vector<64x128xbf16>,
    %c1 = arith.constant 1 : index
    %c0_5 = arith.constant 0 : index
    %9 = vector.load %arg1[%c1, %c0_5] : memref<10x128xi32, #tpu.memory_space<vmem>>, vector<1x128xi32>
    %10 = vector.broadcast %0 : vector<64x1xi32> to vector<64x128xi32>
    %11 = vector.broadcast %9 : vector<1x128xi32> to vector<64x128xi32>
    %12 = arith.cmpi eq, %10, %11 : vector<64x128xi32>
    %13 = arith.extui %12 : vector<64x128xi1> to vector<64x128xi32>
    %14 = arith.sitofp %13 : vector<64x128xi32> to vector<64x128xf32>
    %15 = arith.truncf %14 : vector<64x128xf32> to vector<64x128xbf16>
    %c64 = arith.constant 64 : index
    %c0_6 = arith.constant 0 : index
    %16 = vector.load %arg10[%c64, %c0_6] : memref<640x128xbf16, #tpu.memory_space<vmem>>, vector<64x128xbf16>
    tpu.vector_store %arg10[%c64, %c0_6], %15 {strides = array<i32>} : memref<640x128xbf16, #tpu.memory_space<vmem>>, vector<64x128xbf16>,
    %c2 = arith.constant 2 : index
    %c0_7 = arith.constant 0 : index
    %17 = vector.load %arg1[%c2, %c0_7] : memref<10x128xi32, #tpu.memory_space<vmem>>, vector<1x128xi32>
    %18 = vector.broadcast %0 : vector<64x1xi32> to vector<64x128xi32>
    %19 = vector.broadcast %17 : vector<1x128xi32> to vector<64x128xi32>
    %20 = arith.cmpi eq, %18, %19 : vector<64x128xi32>
    %21 = arith.extui %20 : vector<64x128xi1> to vector<64x128xi32>
    %22 = arith.sitofp %21 : vector<64x128xi32> to vector<64x128xf32>
    %23 = arith.truncf %22 : vector<64x128xf32> to vector<64x128xbf16>
    %c128 = arith.constant 128 : index
    %c0_8 = arith.constant 0 : index
    %24 = vector.load %arg10[%c128, %c0_8] : memref<640x128xbf16, #tpu.memory_space<vmem>>, vector<64x128xbf16>
    tpu.vector_store %arg10[%c128, %c0_8], %23 {strides = array<i32>} : memref<640x128xbf16, #tpu.memory_space<vmem>>, vector<64x128xbf16>,
    %c3 = arith.constant 3 : index
    %c0_9 = arith.constant 0 : index
    %25 = vector.load %arg1[%c3, %c0_9] : memref<10x128xi32, #tpu.memory_space<vmem>>, vector<1x128xi32>
    %26 = vector.broadcast %0 : vector<64x1xi32> to vector<64x128xi32>
    %27 = vector.broadcast %25 : vector<1x128xi32> to vector<64x128xi32>
    %28 = arith.cmpi eq, %26, %27 : vector<64x128xi32>
    %29 = arith.extui %28 : vector<64x128xi1> to vector<64x128xi32>
    %30 = arith.sitofp %29 : vector<64x128xi32> to vector<64x128xf32>
    %31 = arith.truncf %30 : vector<64x128xf32> to vector<64x128xbf16>
    %c192 = arith.constant 192 : index
    %c0_10 = arith.constant 0 : index
    %32 = vector.load %arg10[%c192, %c0_10] : memref<640x128xbf16, #tpu.memory_space<vmem>>, vector<64x128xbf16>
    tpu.vector_store %arg10[%c192, %c0_10], %31 {strides = array<i32>} : memref<640x128xbf16, #tpu.memory_space<vmem>>, vector<64x128xbf16>,
    %c4 = arith.constant 4 : index
    %c0_11 = arith.constant 0 : index
    %33 = vector.load %arg1[%c4, %c0_11] : memref<10x128xi32, #tpu.memory_space<vmem>>, vector<1x128xi32>
    %34 = vector.broadcast %0 : vector<64x1xi32> to vector<64x128xi32>
    %35 = vector.broadcast %33 : vector<1x128xi32> to vector<64x128xi32>
    %36 = arith.cmpi eq, %34, %35 : vector<64x128xi32>
    %37 = arith.extui %36 : vector<64x128xi1> to vector<64x128xi32>
    %38 = arith.sitofp %37 : vector<64x128xi32> to vector<64x128xf32>
    %39 = arith.truncf %38 : vector<64x128xf32> to vector<64x128xbf16>
    %c256 = arith.constant 256 : index
    %c0_12 = arith.constant 0 : index
    %40 = vector.load %arg10[%c256, %c0_12] : memref<640x128xbf16, #tpu.memory_space<vmem>>, vector<64x128xbf16>
    tpu.vector_store %arg10[%c256, %c0_12], %39 {strides = array<i32>} : memref<640x128xbf16, #tpu.memory_space<vmem>>, vector<64x128xbf16>,
    %c5 = arith.constant 5 : index
    %c0_13 = arith.constant 0 : index
    %41 = vector.load %arg1[%c5, %c0_13] : memref<10x128xi32, #tpu.memory_space<vmem>>, vector<1x128xi32>
    %42 = vector.broadcast %0 : vector<64x1xi32> to vector<64x128xi32>
    %43 = vector.broadcast %41 : vector<1x128xi32> to vector<64x128xi32>
    %44 = arith.cmpi eq, %42, %43 : vector<64x128xi32>
    %45 = arith.extui %44 : vector<64x128xi1> to vector<64x128xi32>
    %46 = arith.sitofp %45 : vector<64x128xi32> to vector<64x128xf32>
    %47 = arith.truncf %46 : vector<64x128xf32> to vector<64x128xbf16>
    %c320 = arith.constant 320 : index
    %c0_14 = arith.constant 0 : index
    %48 = vector.load %arg10[%c320, %c0_14] : memref<640x128xbf16, #tpu.memory_space<vmem>>, vector<64x128xbf16>
    tpu.vector_store %arg10[%c320, %c0_14], %47 {strides = array<i32>} : memref<640x128xbf16, #tpu.memory_space<vmem>>, vector<64x128xbf16>,
    %c6 = arith.constant 6 : index
    %c0_15 = arith.constant 0 : index
    %49 = vector.load %arg1[%c6, %c0_15] : memref<10x128xi32, #tpu.memory_space<vmem>>, vector<1x128xi32>
    %50 = vector.broadcast %0 : vector<64x1xi32> to vector<64x128xi32>
    %51 = vector.broadcast %49 : vector<1x128xi32> to vector<64x128xi32>
    %52 = arith.cmpi eq, %50, %51 : vector<64x128xi32>
    %53 = arith.extui %52 : vector<64x128xi1> to vector<64x128xi32>
    %54 = arith.sitofp %53 : vector<64x128xi32> to vector<64x128xf32>
    %55 = arith.truncf %54 : vector<64x128xf32> to vector<64x128xbf16>
    %c384 = arith.constant 384 : index
    %c0_16 = arith.constant 0 : index
    %56 = vector.load %arg10[%c384, %c0_16] : memref<640x128xbf16, #tpu.memory_space<vmem>>, vector<64x128xbf16>
    tpu.vector_store %arg10[%c384, %c0_16], %55 {strides = array<i32>} : memref<640x128xbf16, #tpu.memory_space<vmem>>, vector<64x128xbf16>,
    %c7 = arith.constant 7 : index
    %c0_17 = arith.constant 0 : index
    %57 = vector.load %arg1[%c7, %c0_17] : memref<10x128xi32, #tpu.memory_space<vmem>>, vector<1x128xi32>
    %58 = vector.broadcast %0 : vector<64x1xi32> to vector<64x128xi32>
    %59 = vector.broadcast %57 : vector<1x128xi32> to vector<64x128xi32>
    %60 = arith.cmpi eq, %58, %59 : vector<64x128xi32>
    %61 = arith.extui %60 : vector<64x128xi1> to vector<64x128xi32>
    %62 = arith.sitofp %61 : vector<64x128xi32> to vector<64x128xf32>
    %63 = arith.truncf %62 : vector<64x128xf32> to vector<64x128xbf16>
    %c448 = arith.constant 448 : index
    %c0_18 = arith.constant 0 : index
    %64 = vector.load %arg10[%c448, %c0_18] : memref<640x128xbf16, #tpu.memory_space<vmem>>, vector<64x128xbf16>
    tpu.vector_store %arg10[%c448, %c0_18], %63 {strides = array<i32>} : memref<640x128xbf16, #tpu.memory_space<vmem>>, vector<64x128xbf16>,
    %c8 = arith.constant 8 : index
    %c0_19 = arith.constant 0 : index
    %65 = vector.load %arg1[%c8, %c0_19] : memref<10x128xi32, #tpu.memory_space<vmem>>, vector<1x128xi32>
    %66 = vector.broadcast %0 : vector<64x1xi32> to vector<64x128xi32>
    %67 = vector.broadcast %65 : vector<1x128xi32> to vector<64x128xi32>
    %68 = arith.cmpi eq, %66, %67 : vector<64x128xi32>
    %69 = arith.extui %68 : vector<64x128xi1> to vector<64x128xi32>
    %70 = arith.sitofp %69 : vector<64x128xi32> to vector<64x128xf32>
    %71 = arith.truncf %70 : vector<64x128xf32> to vector<64x128xbf16>
    %c512 = arith.constant 512 : index
    %c0_20 = arith.constant 0 : index
    %72 = vector.load %arg10[%c512, %c0_20] : memref<640x128xbf16, #tpu.memory_space<vmem>>, vector<64x128xbf16>
    tpu.vector_store %arg10[%c512, %c0_20], %71 {strides = array<i32>} : memref<640x128xbf16, #tpu.memory_space<vmem>>, vector<64x128xbf16>,
    %c9 = arith.constant 9 : index
    %c0_21 = arith.constant 0 : index
    %73 = vector.load %arg1[%c9, %c0_21] : memref<10x128xi32, #tpu.memory_space<vmem>>, vector<1x128xi32>
    %74 = vector.broadcast %0 : vector<64x1xi32> to vector<64x128xi32>
    %75 = vector.broadcast %73 : vector<1x128xi32> to vector<64x128xi32>
    %76 = arith.cmpi eq, %74, %75 : vector<64x128xi32>
    %77 = arith.extui %76 : vector<64x128xi1> to vector<64x128xi32>
    %78 = arith.sitofp %77 : vector<64x128xi32> to vector<64x128xf32>
    %79 = arith.truncf %78 : vector<64x128xf32> to vector<64x128xbf16>
    %c576 = arith.constant 576 : index
    %c0_22 = arith.constant 0 : index
    %80 = vector.load %arg10[%c576, %c0_22] : memref<640x128xbf16, #tpu.memory_space<vmem>>, vector<64x128xbf16>
    tpu.vector_store %arg10[%c576, %c0_22], %79 {strides = array<i32>} : memref<640x128xbf16, #tpu.memory_space<vmem>>, vector<64x128xbf16>,
    %c0_23 = arith.constant 0 : index
    %c0_24 = arith.constant 0 : index
    %81 = vector.load %arg3[%c0_23, %c0_24] : memref<64x640xbf16, #tpu.memory_space<vmem>>, vector<64x640xbf16>
    %c0_25 = arith.constant 0 : index
    %c0_26 = arith.constant 0 : index
    %82 = vector.load %arg10[%c0_25, %c0_26] : memref<640x128xbf16, #tpu.memory_space<vmem>>, vector<640x128xbf16>
    %cst = arith.constant dense<0.000000e+00> : vector<64x128xf32>
    %83 = tpu.matmul %81, %82, %cst {dimension_numbers = #tpu.dot_dimension_numbers<[1], [0], [0], [1], [0, 0, 1, 1], [], []>} : vector<64x640xbf16>, vector<640x128xbf16>, vector<64x128xf32> -> vector<64x128xf32>
    %c0_27 = arith.constant 0 : index
    %c0_28 = arith.constant 0 : index
    %84 = vector.load %arg4[%c0_27, %c0_28] : memref<64x1xf32, #tpu.memory_space<vmem>>, vector<64x1xf32>
    %85 = vector.broadcast %84 : vector<64x1xf32> to vector<64x128xf32>
    %86 = arith.addf %83, %85 : vector<64x128xf32>
    %cst_29 = arith.constant 0.000000e+00 : f32
    %87 = vector.broadcast %cst_29 : f32 to vector<64x128xf32>
    %88 = arith.maximumf %86, %87 : vector<64x128xf32>
    %c0_30 = arith.constant 0 : index
    %c0_31 = arith.constant 0 : index
    %89 = vector.load %arg5[%c0_30, %c0_31] : memref<32x64xf32, #tpu.memory_space<vmem>>, vector<32x64xf32>
    %cst_32 = arith.constant dense<0.000000e+00> : vector<32x128xf32>
    %90 = tpu.matmul %89, %88, %cst_32 {dimension_numbers = #tpu.dot_dimension_numbers<[1], [0], [0], [1], [0, 0, 1, 1], [], []>} : vector<32x64xf32>, vector<64x128xf32>, vector<32x128xf32> -> vector<32x128xf32>
    %c0_33 = arith.constant 0 : index
    %c0_34 = arith.constant 0 : index
    %91 = vector.load %arg6[%c0_33, %c0_34] : memref<32x1xf32, #tpu.memory_space<vmem>>, vector<32x1xf32>
    %92 = vector.broadcast %91 : vector<32x1xf32> to vector<32x128xf32>
    %93 = arith.addf %90, %92 : vector<32x128xf32>
    %cst_35 = arith.constant 0.000000e+00 : f32
    %94 = vector.broadcast %cst_35 : f32 to vector<32x128xf32>
    %95 = arith.maximumf %93, %94 : vector<32x128xf32>
    %c0_36 = arith.constant 0 : index
    %c0_37 = arith.constant 0 : index
    %96 = vector.load %arg7[%c0_36, %c0_37] : memref<32x1xf32, #tpu.memory_space<vmem>>, vector<32x1xf32>
    %97 = vector.broadcast %96 : vector<32x1xf32> to vector<32x128xf32>
    %98 = arith.mulf %95, %97 : vector<32x128xf32>
    %cst_38 = arith.constant dense<0.000000e+00> : vector<128xf32>
    %99 = vector.multi_reduction <add>, %98, %cst_38 [0] : vector<32x128xf32> to vector<128xf32>
    %100 = vector.shape_cast %99 : vector<128xf32> to vector<1x128xf32>
    %c0_39 = arith.constant 0 : index
    %c0_40 = arith.constant 0 : index
    %101 = vector.load %arg8[%c0_39, %c0_40] : memref<1x1xf32, #tpu.memory_space<vmem>>, vector<1x1xf32>
    %102 = vector.broadcast %101 : vector<1x1xf32> to vector<1x128xf32>
    %103 = arith.addf %100, %102 : vector<1x128xf32>
    %104 = arith.negf %103 : vector<1x128xf32>
    %105 = math.exp %104 : vector<1x128xf32>
    %cst_41 = arith.constant 1.000000e+00 : f32
    %106 = vector.broadcast %cst_41 : f32 to vector<1x128xf32>
    %107 = arith.addf %106, %105 : vector<1x128xf32>
    %108 = arith.divf %106, %107 : vector<1x128xf32>
    %c0_42 = arith.constant 0 : index
    %c0_43 = arith.constant 0 : index
    %109 = vector.load %arg9[%c0_42, %c0_43] : memref<1x128xf32, #tpu.memory_space<vmem>>, vector<1x128xf32>
    tpu.vector_store %arg9[%c0_42, %c0_43], %108 {strides = array<i32>} : memref<1x128xf32, #tpu.memory_space<vmem>>, vector<1x128xf32>,
    return
  }
  func.func @transform_0(%arg0: i32) -> (i32, i32) {
    %c0_i32 = arith.constant 0 : i32
    %c0_i32_0 = arith.constant 0 : i32
    return %c0_i32, %arg0 : i32, i32
  }
  func.func @transform_1(%arg0: i32) -> (i32, i32) {
    %c0_i32 = arith.constant 0 : i32
    %c0_i32_0 = arith.constant 0 : i32
    %c0_i32_1 = arith.constant 0 : i32
    return %c0_i32, %c0_i32_0 : i32, i32
  }
  func.func @transform_2(%arg0: i32) -> (i32, i32) {
    %c0_i32 = arith.constant 0 : i32
    %c0_i32_0 = arith.constant 0 : i32
    %c0_i32_1 = arith.constant 0 : i32
    return %c0_i32, %c0_i32_0 : i32, i32
  }
  func.func @transform_3(%arg0: i32) -> (i32, i32) {
    %c0_i32 = arith.constant 0 : i32
    %c0_i32_0 = arith.constant 0 : i32
    %c0_i32_1 = arith.constant 0 : i32
    return %c0_i32, %c0_i32_0 : i32, i32
  }
  func.func @transform_4(%arg0: i32) -> (i32, i32) {
    %c0_i32 = arith.constant 0 : i32
    %c0_i32_0 = arith.constant 0 : i32
    %c0_i32_1 = arith.constant 0 : i32
    return %c0_i32, %c0_i32_0 : i32, i32
  }
  func.func @transform_5(%arg0: i32) -> (i32, i32) {
    %c0_i32 = arith.constant 0 : i32
    %c0_i32_0 = arith.constant 0 : i32
    %c0_i32_1 = arith.constant 0 : i32
    return %c0_i32, %c0_i32_0 : i32, i32
  }
  func.func @transform_6(%arg0: i32) -> (i32, i32) {
    %c0_i32 = arith.constant 0 : i32
    %c0_i32_0 = arith.constant 0 : i32
    %c0_i32_1 = arith.constant 0 : i32
    return %c0_i32, %c0_i32_0 : i32, i32
  }
  func.func @transform_7(%arg0: i32) -> (i32, i32) {
    %c0_i32 = arith.constant 0 : i32
    %c0_i32_0 = arith.constant 0 : i32
    %c0_i32_1 = arith.constant 0 : i32
    return %c0_i32, %c0_i32_0 : i32, i32
  }
  func.func @transform_8(%arg0: i32) -> (i32, i32) {
    %c0_i32 = arith.constant 0 : i32
    %c0_i32_0 = arith.constant 0 : i32
    return %c0_i32, %arg0 : i32, i32
  }
}

</mosaic_0001>

<bundles_post_ra>
// kernel: tpu_custom_call.1
= control target key start
LH: loop header
LB: loop body
LE: loop exit
PB: predicated region body
PF: predicated region fallthrough
CT: control target
= control target key end

     0   :  { %s2873_s0 = inlined_call_operand.hbm [shape: s32[10,128], index: 0, kind: input, shape index: {}]   ;;  %s2874_s1 = inlined_call_operand.vmem [shape: s32[64,1], index: 1, kind: input, shape index: {}]   ;;  %s2875_s2 = inlined_call_operand.vmem [shape: bf16[64,640], index: 2, kind: input, shape index: {}]   ;;  %s2876_s3 = inlined_call_operand.vmem [shape: f32[64,1], index: 3, kind: input, shape index: {}]   ;;  %s2877_s4 = inlined_call_operand.vmem [shape: f32[32,64], index: 4, kind: input, shape index: {}]   ;;  %s2878_s5 = inlined_call_operand.vmem [shape: f32[32,1], index: 5, kind: input, shape index: {}]   ;;  %s2879_s6 = inlined_call_operand.vmem [shape: f32[32,1], index: 6, kind: input, shape index: {}]   ;;  %s2880_s7 = inlined_call_operand.<no memory space> [shape: f32[1,1], index: 7, kind: input, shape index: {}]   ;;  %s2881_s8 = inlined_call_operand.hbm [shape: f32[1,128], index: 8, kind: output, shape index: {}]  }
   0x1   :  { %v13_v0 = vstv %s2880_s7 }
   0x2   :  { %14 = vst [vmem:[#allocation3] sm:$0x1] %v13_v0 }
   0x3   :  { %15 = vsyncpa [#allocation5], 0 }
   0x4   :  { %16 = vsyncpa [#allocation6], 0  ;;  %s2416_s29 = smov [#allocation4]  }
   0x5   :  { %s22_s30 = sshll.u32 %s2416_s29, 4  ;;  %s23_s30 = int_to_ptr.vmem [resolvable:$true] %s22_s30 }
   0x6   :  { %s2380_s9 = scalar_lea.vmem %s23_s30, 256  ;;  %p2385_p1 = scmp.lt.s32.totalorder %s23_s30, %s23_s30 }
   0x7   :  { %p2381_p0 = scmp.ne.s32.totalorder %s23_s30, %s2380_s9  ;;  %p2386_p2 = scmp.lt.s32.totalorder %s2380_s9, %s2380_s9 }
   0x9   :  { %p2387_p3 = por %p2386_p2, %p2385_p1 }
   0xb   :  { %p2388_p4 = pnand %p2387_p3, %p2381_p0 }
   0xd   :  { %2391 = shalt.err (!%p2388_p4)
}
   0xe   :  { %s2417_s10 = smov 128   ;;  %s2418_s11 = smov 8  }
   0xf   :  { %28 = dma.hbm_to_vmem [thread:$0]  %s2873_s0, 256, %s23_s30, [#allocation5], %s2417_s10, %s2417_s10, %s2418_s11  }
  0x10   :  { %2412 = dma.done.wait [#allocation5], 256  }
  0x11   :  { %2413 = vsyncadd [#allocation5], 4294967040  ;;  %v2419_v1 = vmov 0   ;;  %v53_v2 = vld [vmem:[%s2874_s1 + $0x30] sm:$0xff]  ;;  %v51_v3 = vld [vmem:[%s2874_s1 + $0x20] sm:$0xff]  ;;  %v2420_v40 = vmov 0.0  }
  0x12   :  { %2299 = vset.pattern.permute.xlu1 %v2419_v1  ;;  %2298 = vset.pattern.permute.xlu0 %v2419_v1  ;;  %v54_v4 = vld [vmem:[%s2874_s1 + $0x38] sm:$0xff]  ;;  %v52_v5 = vld [vmem:[%s2874_s1 + $0x28] sm:$0xff]  ;;  %v49_v7 = vld [vmem:[%s2874_s1 + $0x10] sm:$0xff] }
  0x13   :  { %75 = vperm.xlu0 %2298, %v53_v2   ;;  %69 = vperm.xlu1 %2299, %v51_v3   ;;  %v50_v6 = vld [vmem:[%s2874_s1 + $0x18] sm:$0xff]  ;;  %v48_v8 = vld [vmem:[%s2874_s1 + $0x8] sm:$0xff]  ;;  %v47_v9 = vld [vmem:[%s2874_s1] sm:$0xff] }
  0x14   :  { %v879_v10 = vld [vmem:[%s2876_s3 + $0x30] sm:$0xff]  ;;  %v880_v11 = vld [vmem:[%s2876_s3 + $0x38] sm:$0xff]  ;;  %v877_v12 = vld [vmem:[%s2876_s3 + $0x20] sm:$0xff] }
  0x15   :  { %v878_v13 = vld [vmem:[%s2876_s3 + $0x28] sm:$0xff]  ;;  %v875_v14 = vld [vmem:[%s2876_s3 + $0x10] sm:$0xff]  ;;  %v876_v15 = vld [vmem:[%s2876_s3 + $0x18] sm:$0xff] }
  0x16   :  { %v873_v16 = vld [vmem:[%s2876_s3] sm:$0xff]  ;;  %v874_v17 = vld [vmem:[%s2876_s3 + $0x8] sm:$0xff]  ;;  %v1475_v20 = vld [vmem:[%s2878_s5 + $0x18] sm:$0xff] }
  0x17   :  { %78 = vperm.xlu0 %2298, %v54_v4   ;;  %72 = vperm.xlu1 %2299, %v52_v5   ;;  %v1473_v18 = vld [vmem:[%s2878_s5 + $0x8] sm:$0xff]  ;;  %v1472_v19 = vld [vmem:[%s2878_s5] sm:$0xff]  ;;  %v1474_v21 = vld [vmem:[%s2878_s5 + $0x10] sm:$0xff] }
  0x18   :  { %v1599_v22 = vld [vmem:[%s2879_s6 + $0x8] sm:$0xff]  ;;  %v1598_v23 = vld [vmem:[%s2879_s6] sm:$0xff]  ;;  %v1601_v24 = vld [vmem:[%s2879_s6 + $0x18] sm:$0xff] }
  0x19   :  { %v1600_v25 = vld [vmem:[%s2879_s6 + $0x10] sm:$0xff]  ;;  %v1635_v26 = vld [vmem:[#allocation3] sm:$0x1]  ;;  %v2335_v27 = vld [vmem:[%s2875_s2 + $0x4] ss:$20 sps:$4 sm:$0xff]  }
  0x1a   :  { %v2338_v28 = vld [vmem:[%s2875_s2 + $0xc] ss:$20 sps:$4 sm:$0xff]   ;;  %1297 = vmatprep.mubr.bf16.mxu0 %v2335_v27  ;;  %v2557_v32 = vld [vmem:[#allocation4 + $0x3] ss:$0 sm:$0xff]  ;;  %v2559_v33 = vld [vmem:[#allocation4 + $0x4] ss:$0 sm:$0xff] }
  0x1b   :  { %66 = vperm.xlu1 %2299, %v50_v6   ;;  %63 = vperm.xlu0 %2298, %v49_v7   ;;  %v2551_v29 = vld [vmem:[#allocation4] ss:$0 sm:$0xff]  ;;  %v2553_v30 = vld [vmem:[#allocation4 + $0x1] ss:$0 sm:$0xff]  ;;  %v2555_v31 = vld [vmem:[#allocation4 + $0x2] ss:$0 sm:$0xff] }
  0x1c   :  { %1362 = vmatprep.mubr.bf16.mxu1 %v2338_v28  ;;  %v2561_v34 = vld [vmem:[#allocation4 + $0x5] ss:$0 sm:$0xff]  ;;  %v2563_v35 = vld [vmem:[#allocation4 + $0x6] ss:$0 sm:$0xff]  ;;  %v2565_v36 = vld [vmem:[#allocation4 + $0x7] ss:$0 sm:$0xff] }
  0x1d   :  { %v2567_v38 = vld [vmem:[#allocation4 + $0x8] ss:$0 sm:$0xff]  ;;  %v2573_v39 = vld [vmem:[#allocation4 + $0x9] ss:$0 sm:$0xff] }
  0x1f   :  { %60 = vperm.xlu1 %2299, %v48_v8   ;;  %57 = vperm.xlu0 %2298, %v47_v9  }
  0x23   :  { %913 = vperm.xlu1 %2299, %v879_v10   ;;  %918 = vperm.xlu0 %2298, %v880_v11  }
  0x27   :  { %903 = vperm.xlu1 %2299, %v877_v12   ;;  %908 = vperm.xlu0 %2298, %v878_v13  }
  0x2b   :  { %893 = vperm.xlu1 %2299, %v875_v14   ;;  %898 = vperm.xlu0 %2298, %v876_v15  }
  0x2f   :  { %883 = vperm.xlu1 %2299, %v873_v16   ;;  %888 = vperm.xlu0 %2298, %v874_v17  }
  0x33   :  { %1483 = vperm.xlu1 %2299, %v1473_v18   ;;  %1478 = vperm.xlu0 %2298, %v1472_v19  }
  0x37   :  { %1493 = vperm.xlu1 %2299, %v1475_v20   ;;  %1488 = vperm.xlu0 %2298, %v1474_v21  }
  0x3b   :  { %1609 = vperm.xlu1 %2299, %v1599_v22   ;;  %1604 = vperm.xlu0 %2298, %v1598_v23  }
  0x3f   :  { %1619 = vperm.xlu1 %2299, %v1601_v24   ;;  %1614 = vperm.xlu0 %2298, %v1600_v25  }
  0x43   :  { %1638 = vperm.xlu0 %2298, %v1635_v26  }
  0x8e   :  { %v76_v37 = vpop.permute.xlu0 %75  ;;  %v70_v49 = vpop.permute.xlu1 %69 }
  0x8f   :  { %vm90_vm0 = vcmp.eq.s32.totalorder %v76_v37, %v2551_v29  ;;  %vm159_vm1 = vcmp.eq.s32.totalorder %v76_v37, %v2553_v30  ;;  %vm228_vm2 = vcmp.eq.s32.totalorder %v76_v37, %v2555_v31  ;;  %vm297_vm3 = vcmp.eq.s32.totalorder %v76_v37, %v2557_v32 }
  0x90   :  { %v1675_v41 = vsel %vm90_vm0, 1.0, %v2420_v40  ;;  %v1692_v42 = vsel %vm159_vm1, 1.0, %v2420_v40  ;;  %v1709_v43 = vsel %vm228_vm2, 1.0, %v2420_v40  ;;  %v1726_v44 = vsel %vm297_vm3, 1.0, %v2420_v40 }
  0x91   :  { %vm366_vm4 = vcmp.eq.s32.totalorder %v76_v37, %v2559_v33  ;;  %vm435_vm5 = vcmp.eq.s32.totalorder %v76_v37, %v2561_v34  ;;  %vm504_vm6 = vcmp.eq.s32.totalorder %v76_v37, %v2563_v35  ;;  %vm573_vm7 = vcmp.eq.s32.totalorder %v76_v37, %v2565_v36 }
  0x92   :  { %v2584_v45 = vsel %vm366_vm4, 1.0, %v2420_v40  ;;  %v2587_v46 = vsel %vm435_vm5, 1.0, %v2420_v40  ;;  %v2590_v47 = vsel %vm504_vm6, 1.0, %v2420_v40  ;;  %v2593_v48 = vsel %vm573_vm7, 1.0, %v2420_v40  ;;  %v79_v58 = vpop.permute.xlu0 %78  ;;  %v73_v7 = vpop.permute.xlu1 %72 }
  0x93   :  { %vm642_vm8 = vcmp.eq.s32.totalorder %v76_v37, %v2567_v38  ;;  %vm711_vm9 = vcmp.eq.s32.totalorder %v76_v37, %v2573_v39  ;;  %vm88_vm10 = vcmp.eq.s32.totalorder %v70_v49, %v2551_v29  ;;  %vm157_vm11 = vcmp.eq.s32.totalorder %v70_v49, %v2553_v30 }
  0x94   :  { %v2600_v50 = vsel %vm642_vm8, 1.0, %v2420_v40  ;;  %v2603_v51 = vsel %vm711_vm9, 1.0, %v2420_v40  ;;  %v2606_v52 = vsel %vm88_vm10, 1.0, %v2420_v40  ;;  %v2609_v53 = vsel %vm157_vm11, 1.0, %v2420_v40 }
  0x95   :  { %vm226_vm12 = vcmp.eq.s32.totalorder %v70_v49, %v2555_v31  ;;  %vm295_vm13 = vcmp.eq.s32.totalorder %v70_v49, %v2557_v32  ;;  %vm364_vm14 = vcmp.eq.s32.totalorder %v70_v49, %v2559_v33  ;;  %vm433_vm15 = vcmp.eq.s32.totalorder %v70_v49, %v2561_v34 }
  0x96   :  { %v2616_v54 = vsel %vm226_vm12, 1.0, %v2420_v40  ;;  %v2619_v55 = vsel %vm295_vm13, 1.0, %v2420_v40  ;;  %v2622_v56 = vsel %vm364_vm14, 1.0, %v2420_v40  ;;  %v2625_v57 = vsel %vm433_vm15, 1.0, %v2420_v40 }
  0x97   :  { %vm502_vm0 = vcmp.eq.s32.totalorder %v70_v49, %v2563_v35  ;;  %vm571_vm1 = vcmp.eq.s32.totalorder %v70_v49, %v2565_v36  ;;  %vm640_vm2 = vcmp.eq.s32.totalorder %v70_v49, %v2567_v38  ;;  %vm709_vm3 = vcmp.eq.s32.totalorder %v70_v49, %v2573_v39 }
  0x98   :  { %v2632_v59 = vsel %vm502_vm0, 1.0, %v2420_v40  ;;  %v2635_v60 = vsel %vm571_vm1, 1.0, %v2420_v40  ;;  %v2638_v61 = vsel %vm640_vm2, 1.0, %v2420_v40  ;;  %v2641_v62 = vsel %vm709_vm3, 1.0, %v2420_v40 }
  0x99   :  { %vm91_vm4 = vcmp.eq.s32.totalorder %v79_v58, %v2551_v29  ;;  %vm160_vm5 = vcmp.eq.s32.totalorder %v79_v58, %v2553_v30  ;;  %vm229_vm6 = vcmp.eq.s32.totalorder %v79_v58, %v2555_v31  ;;  %vm298_vm7 = vcmp.eq.s32.totalorder %v79_v58, %v2557_v32 }
  0x9a   :  { %v1676_v63 = vsel %vm91_vm4, 1.0, %v2420_v40  ;;  %v1693_v0 = vsel %vm160_vm5, 1.0, %v2420_v40  ;;  %v1710_v1 = vsel %vm229_vm6, 1.0, %v2420_v40  ;;  %v1727_v2 = vsel %vm298_vm7, 1.0, %v2420_v40 }
  0x9b   :  { %v1993_v3 = vpack.c.bf16 %v1676_v63, %v1675_v41  ;;  %v2005_v4 = vpack.c.bf16 %v1693_v0, %v1692_v42  ;;  %v2017_v5 = vpack.c.bf16 %v1710_v1, %v1709_v43  ;;  %v2029_v6 = vpack.c.bf16 %v1727_v2, %v1726_v44  ;;  %v67_v44 = vpop.permute.xlu1 %66 }
  0x9c   :  { %vm367_vm8 = vcmp.eq.s32.totalorder %v79_v58, %v2559_v33  ;;  %vm436_vm9 = vcmp.eq.s32.totalorder %v79_v58, %v2561_v34  ;;  %vm505_vm10 = vcmp.eq.s32.totalorder %v79_v58, %v2563_v35  ;;  %vm574_vm11 = vcmp.eq.s32.totalorder %v79_v58, %v2565_v36 }
  0x9d   :  { %2105 = vst [vmem:[#allocation2 + $0x18] sm:$0xff] %v1993_v3   ;;  %2109 = vst [vmem:[#allocation2 + $0x38] sm:$0xff] %v2005_v4   ;;  %v1744_v8 = vsel %vm367_vm8, 1.0, %v2420_v40  ;;  %v1761_v9 = vsel %vm436_vm9, 1.0, %v2420_v40  ;;  %v1778_v10 = vsel %vm505_vm10, 1.0, %v2420_v40  ;;  %v1795_v11 = vsel %vm574_vm11, 1.0, %v2420_v40 }
  0x9e   :  { %2113 = vst [vmem:[#allocation2 + $0x58] sm:$0xff] %v2017_v5   ;;  %2117 = vst [vmem:[#allocation2 + $0x78] sm:$0xff] %v2029_v6   ;;  %v2041_v12 = vpack.c.bf16 %v1744_v8, %v2584_v45  ;;  %v2053_v13 = vpack.c.bf16 %v1761_v9, %v2587_v46  ;;  %v2065_v14 = vpack.c.bf16 %v1778_v10, %v2590_v47 }
  0x9f   :  { %v2077_v15 = vpack.c.bf16 %v1795_v11, %v2593_v48  ;;  %vm643_vm12 = vcmp.eq.s32.totalorder %v79_v58, %v2567_v38  ;;  %vm712_vm13 = vcmp.eq.s32.totalorder %v79_v58, %v2573_v39  ;;  %vm89_vm14 = vcmp.eq.s32.totalorder %v73_v7, %v2551_v29 }
  0xa0   :  { %vm158_vm15 = vcmp.eq.s32.totalorder %v73_v7, %v2553_v30  ;;  %2121 = vst [vmem:[#allocation2 + $0x98] sm:$0xff] %v2041_v12   ;;  %2125 = vst [vmem:[#allocation2 + $0xb8] sm:$0xff] %v2053_v13   ;;  %v1812_v16 = vsel %vm643_vm12, 1.0, %v2420_v40  ;;  %v1829_v17 = vsel %vm712_vm13, 1.0, %v2420_v40  ;;  %v1674_v18 = vsel %vm89_vm14, 1.0, %v2420_v40 }
  0xa1   :  { %2129 = vst [vmem:[#allocation2 + $0xd8] sm:$0xff] %v2065_v14   ;;  %2133 = vst [vmem:[#allocation2 + $0xf8] sm:$0xff] %v2077_v15   ;;  %v1691_v19 = vsel %vm158_vm15, 1.0, %v2420_v40  ;;  %v2089_v20 = vpack.c.bf16 %v1812_v16, %v2600_v50  ;;  %v2101_v21 = vpack.c.bf16 %v1829_v17, %v2603_v51  ;;  %v1990_v22 = vpack.c.bf16 %v1674_v18, %v2606_v52  ;;  %v61_v17 = vpop.permute.xlu1 %60 }
  0xa2   :  { %v2002_v23 = vpack.c.bf16 %v1691_v19, %v2609_v53  ;;  %vm227_vm0 = vcmp.eq.s32.totalorder %v73_v7, %v2555_v31  ;;  %vm296_vm1 = vcmp.eq.s32.totalorder %v73_v7, %v2557_v32  ;;  %vm365_vm2 = vcmp.eq.s32.totalorder %v73_v7, %v2559_v33 }
  0xa3   :  { %vm434_vm3 = vcmp.eq.s32.totalorder %v73_v7, %v2561_v34  ;;  %2137 = vst [vmem:[#allocation2 + $0x118] sm:$0xff] %v2089_v20   ;;  %2141 = vst [vmem:[#allocation2 + $0x138] sm:$0xff] %v2101_v21   ;;  %v1708_v24 = vsel %vm227_vm0, 1.0, %v2420_v40  ;;  %v1725_v25 = vsel %vm296_vm1, 1.0, %v2420_v40  ;;  %v1742_v26 = vsel %vm365_vm2, 1.0, %v2420_v40 }
  0xa4   :  { %2104 = vst [vmem:[#allocation2 + $0x10] sm:$0xff] %v1990_v22   ;;  %2108 = vst [vmem:[#allocation2 + $0x30] sm:$0xff] %v2002_v23   ;;  %v1759_v27 = vsel %vm434_vm3, 1.0, %v2420_v40  ;;  %v2014_v28 = vpack.c.bf16 %v1708_v24, %v2616_v54  ;;  %v2026_v37 = vpack.c.bf16 %v1725_v25, %v2619_v55  ;;  %v2038_v41 = vpack.c.bf16 %v1742_v26, %v2622_v56  ;;  %v2302_v45 = vld [vmem:[#allocation2 + $0x38] sm:$0xff]  }
  0xa5   :  { %v2050_v42 = vpack.c.bf16 %v1759_v27, %v2625_v57  ;;  %v2300_v43 = vld [vmem:[#allocation2 + $0x78] sm:$0xff]   ;;  %vm503_vm4 = vcmp.eq.s32.totalorder %v73_v7, %v2563_v35  ;;  %vm572_vm5 = vcmp.eq.s32.totalorder %v73_v7, %v2565_v36  ;;  %vm641_vm6 = vcmp.eq.s32.totalorder %v73_v7, %v2567_v38 }
  0xa6   :  { %vm710_vm7 = vcmp.eq.s32.totalorder %v73_v7, %v2573_v39  ;;  %2112 = vst [vmem:[#allocation2 + $0x50] sm:$0xff] %v2014_v28   ;;  %2116 = vst [vmem:[#allocation2 + $0x70] sm:$0xff] %v2026_v37   ;;  %v1776_v46 = vsel %vm503_vm4, 1.0, %v2420_v40  ;;  %v1793_v47 = vsel %vm572_vm5, 1.0, %v2420_v40  ;;  %v1810_v48 = vsel %vm641_vm6, 1.0, %v2420_v40  ;;  %2142 = vmatprep.subr.bf16.mxu0 %v2300_v43 }
  0xa7   :  { %2120 = vst [vmem:[#allocation2 + $0x90] sm:$0xff] %v2038_v41   ;;  %2124 = vst [vmem:[#allocation2 + $0xb0] sm:$0xff] %v2050_v42   ;;  %v1827_v49 = vsel %vm710_vm7, 1.0, %v2420_v40  ;;  %v2062_v50 = vpack.c.bf16 %v1776_v46, %v2632_v59  ;;  %v2074_v51 = vpack.c.bf16 %v1793_v47, %v2635_v60  ;;  %v2086_v52 = vpack.c.bf16 %v1810_v48, %v2638_v61  ;;  %v2303_v55 = vld [vmem:[#allocation2 + $0xb8] sm:$0xff]   ;;  %v64_v60 = vpop.permute.xlu0 %63 }
  0xa8   :  { %v2098_v53 = vpack.c.bf16 %v1827_v49, %v2641_v62  ;;  %v2301_v54 = vld [vmem:[#allocation2 + $0xf8] sm:$0xff]   ;;  %2143 = vmatpush3.bf16.msra.mxu0 %v2302_v45  ;;  %vm87_vm8 = vcmp.eq.s32.totalorder %v67_v44, %v2551_v29  ;;  %vm156_vm9 = vcmp.eq.s32.totalorder %v67_v44, %v2553_v30  ;;  %vm225_vm10 = vcmp.eq.s32.totalorder %v67_v44, %v2555_v31 }
  0xa9   :  { %vm294_vm11 = vcmp.eq.s32.totalorder %v67_v44, %v2557_v32  ;;  %2128 = vst [vmem:[#allocation2 + $0xd0] sm:$0xff] %v2062_v50   ;;  %2132 = vst [vmem:[#allocation2 + $0xf0] sm:$0xff] %v2074_v51   ;;  %v1672_v56 = vsel %vm87_vm8, 1.0, %v2420_v40  ;;  %v1689_v57 = vsel %vm156_vm9, 1.0, %v2420_v40  ;;  %v1706_v58 = vsel %vm225_vm10, 1.0, %v2420_v40  ;;  %2182 = vmatprep.subr.bf16.mxu1 %v2301_v54 }
  0xaa   :  { %2136 = vst [vmem:[#allocation2 + $0x110] sm:$0xff] %v2086_v52   ;;  %2140 = vst [vmem:[#allocation2 + $0x130] sm:$0xff] %v2098_v53   ;;  %v1723_v59 = vsel %vm294_vm11, 1.0, %v2420_v40  ;;  %vm363_vm12 = vcmp.eq.s32.totalorder %v67_v44, %v2559_v33  ;;  %vm432_vm13 = vcmp.eq.s32.totalorder %v67_v44, %v2561_v34  ;;  %vm501_vm14 = vcmp.eq.s32.totalorder %v67_v44, %v2563_v35 }
  0xab   :  { %vm570_vm15 = vcmp.eq.s32.totalorder %v67_v44, %v2565_v36  ;;  %2183 = vmatpush3.bf16.msra.mxu1 %v2303_v55  ;;  %v1740_v61 = vsel %vm363_vm12, 1.0, %v2420_v40  ;;  %v1757_v62 = vsel %vm432_vm13, 1.0, %v2420_v40  ;;  %v1774_v63 = vsel %vm501_vm14, 1.0, %v2420_v40  ;;  %v2306_v10 = vld [vmem:[#allocation2 + $0x30] sm:$0xff]   ;;  %v58_v43 = vpop.permute.xlu0 %57 }
  0xac   :  { %v1791_v0 = vsel %vm570_vm15, 1.0, %v2420_v40  ;;  %vm639_vm0 = vcmp.eq.s32.totalorder %v67_v44, %v2567_v38  ;;  %vm708_vm1 = vcmp.eq.s32.totalorder %v67_v44, %v2573_v39  ;;  %vm86_vm2 = vcmp.eq.s32.totalorder %v64_v60, %v2551_v29 }
  0xad   :  { %vm155_vm3 = vcmp.eq.s32.totalorder %v64_v60, %v2553_v30  ;;  %v1808_v1 = vsel %vm639_vm0, 1.0, %v2420_v40  ;;  %v1825_v2 = vsel %vm708_vm1, 1.0, %v2420_v40  ;;  %v1671_v3 = vsel %vm86_vm2, 1.0, %v2420_v40  ;;  %v2304_v7 = vld [vmem:[#allocation2 + $0x70] sm:$0xff]  }
  0xae   :  { %v1688_v4 = vsel %vm155_vm3, 1.0, %v2420_v40  ;;  %v1987_v5 = vpack.c.bf16 %v1672_v56, %v1671_v3  ;;  %vm224_vm4 = vcmp.eq.s32.totalorder %v64_v60, %v2555_v31  ;;  %vm293_vm5 = vcmp.eq.s32.totalorder %v64_v60, %v2557_v32  ;;  %2144 = vmatprep.subr.bf16.mxu0 %v2304_v7  ;;  %v2307_v21 = vld [vmem:[#allocation2 + $0xb0] sm:$0xff]  }
  0xaf   :  { %v1999_v6 = vpack.c.bf16 %v1689_v57, %v1688_v4  ;;  %v1705_v8 = vsel %vm224_vm4, 1.0, %v2420_v40  ;;  %v1722_v9 = vsel %vm293_vm5, 1.0, %v2420_v40  ;;  %vm362_vm6 = vcmp.eq.s32.totalorder %v64_v60, %v2559_v33  ;;  %2145 = vmatpush3.bf16.msra.mxu0 %v2306_v10  ;;  %v2316_v4 = vld [vmem:[#allocation2 + $0x58] sm:$0xff]   ;;  %v2320_v7 = vld [vmem:[#allocation2 + $0x50] sm:$0xff]  }
  0xb0   :  { %vm431_vm7 = vcmp.eq.s32.totalorder %v64_v60, %v2561_v34  ;;  %2103 = vst [vmem:[#allocation2 + $0x8] sm:$0xff] %v1987_v5   ;;  %v2011_v11 = vpack.c.bf16 %v1706_v58, %v1705_v8  ;;  %v2023_v12 = vpack.c.bf16 %v1723_v59, %v1722_v9  ;;  %v1739_v13 = vsel %vm362_vm6, 1.0, %v2420_v40  ;;  %v2305_v18 = vld [vmem:[#allocation2 + $0xf0] sm:$0xff]  }
  0xb1   :  { %2107 = vst [vmem:[#allocation2 + $0x28] sm:$0xff] %v1999_v6   ;;  %v1756_v14 = vsel %vm431_vm7, 1.0, %v2420_v40  ;;  %v2035_v15 = vpack.c.bf16 %v1740_v61, %v1739_v13  ;;  %vm500_vm8 = vcmp.eq.s32.totalorder %v64_v60, %v2563_v35  ;;  %vm569_vm9 = vcmp.eq.s32.totalorder %v64_v60, %v2565_v36  ;;  %2184 = vmatprep.subr.bf16.mxu1 %v2305_v18  ;;  %v2318_v6 = vld [vmem:[#allocation2 + $0x18] sm:$0xff]   ;;  %v2321_v8 = vld [vmem:[#allocation2 + $0xd0] sm:$0xff]  }
  0xb2   :  { %v2047_v16 = vpack.c.bf16 %v1757_v62, %v1756_v14  ;;  %2111 = vst [vmem:[#allocation2 + $0x48] sm:$0xff] %v2011_v11   ;;  %2115 = vst [vmem:[#allocation2 + $0x68] sm:$0xff] %v2023_v12   ;;  %v1773_v19 = vsel %vm500_vm8, 1.0, %v2420_v40  ;;  %v1790_v20 = vsel %vm569_vm9, 1.0, %v2420_v40  ;;  %vm638_vm10 = vcmp.eq.s32.totalorder %v64_v60, %v2567_v38  ;;  %2185 = vmatpush3.bf16.msra.mxu1 %v2307_v21  ;;  %v2322_v9 = vld [vmem:[#allocation2 + $0x10] sm:$0xff]   ;;  %v2332_v18 = vld [vmem:[#allocation2 + $0x138] sm:$0xff]  }
  0xb3   :  { %vm707_vm11 = vcmp.eq.s32.totalorder %v64_v60, %v2573_v39  ;;  %2119 = vst [vmem:[#allocation2 + $0x88] sm:$0xff] %v2035_v15   ;;  %v2059_v22 = vpack.c.bf16 %v1774_v63, %v1773_v19  ;;  %v2071_v23 = vpack.c.bf16 %v1791_v0, %v1790_v20  ;;  %v1807_v24 = vsel %vm638_vm10, 1.0, %v2420_v40  ;;  %v2323_v11 = vld [vmem:[#allocation2 + $0x90] sm:$0xff]   ;;  %v2341_v20 = vld [vmem:[%s2875_s2 + $0x2c] ss:$20 sps:$4 sm:$0xff]  }
  0xb4   :  { %2123 = vst [vmem:[#allocation2 + $0xa8] sm:$0xff] %v2047_v16   ;;  %v1824_v25 = vsel %vm707_vm11, 1.0, %v2420_v40  ;;  %v2083_v26 = vpack.c.bf16 %v1808_v1, %v1807_v24  ;;  %vm85_vm12 = vcmp.eq.s32.totalorder %v61_v17, %v2551_v29  ;;  %vm154_vm13 = vcmp.eq.s32.totalorder %v61_v17, %v2553_v30  ;;  %v2333_v19 = vld [vmem:[%s2875_s2] ss:$20 sps:$4 sm:$0xff]  }
  0xb5   :  { %v2095_v27 = vpack.c.bf16 %v1825_v2, %v1824_v25  ;;  %2127 = vst [vmem:[#allocation2 + $0xc8] sm:$0xff] %v2059_v22   ;;  %2131 = vst [vmem:[#allocation2 + $0xe8] sm:$0xff] %v2071_v23   ;;  %v1670_v28 = vsel %vm85_vm12, 1.0, %v2420_v40  ;;  %v1687_v37 = vsel %vm154_vm13, 1.0, %v2420_v40  ;;  %vm223_vm14 = vcmp.eq.s32.totalorder %v61_v17, %v2555_v31  ;;  %v2336_v22 = vld [vmem:[%s2875_s2 + $0x8] ss:$20 sps:$4 sm:$0xff]  }
  0xb6   :  { %vm292_vm15 = vcmp.eq.s32.totalorder %v61_v17, %v2557_v32  ;;  %2135 = vst [vmem:[#allocation2 + $0x108] sm:$0xff] %v2083_v26   ;;  %v1704_v41 = vsel %vm223_vm14, 1.0, %v2420_v40  ;;  %vm361_vm0 = vcmp.eq.s32.totalorder %v61_v17, %v2559_v33  ;;  %vm430_vm1 = vcmp.eq.s32.totalorder %v61_v17, %v2561_v34  ;;  %v2339_v23 = vld [vmem:[#allocation2 + $0x130] sm:$0xff]   ;;  %v2343_v26 = vld [vmem:[%s2875_s2 + $0x28] ss:$20 sps:$4 sm:$0xff]  }
  0xb7   :  { %2139 = vst [vmem:[#allocation2 + $0x128] sm:$0xff] %v2095_v27   ;;  %v1721_v42 = vsel %vm292_vm15, 1.0, %v2420_v40  ;;  %v1738_v44 = vsel %vm361_vm0, 1.0, %v2420_v40  ;;  %v1755_v45 = vsel %vm430_vm1, 1.0, %v2420_v40  ;;  %vm499_vm2 = vcmp.eq.s32.totalorder %v61_v17, %v2563_v35  ;;  %v2326_v13 = vld [vmem:[#allocation2 + $0x8] sm:$0xff]  }
  0xb8   :  { %vm568_vm3 = vcmp.eq.s32.totalorder %v61_v17, %v2565_v36  ;;  %v1772_v46 = vsel %vm499_vm2, 1.0, %v2420_v40  ;;  %vm637_vm4 = vcmp.eq.s32.totalorder %v61_v17, %v2567_v38  ;;  %vm706_vm5 = vcmp.eq.s32.totalorder %v61_v17, %v2573_v39  ;;  %v2310_v53 = vld [vmem:[#allocation2 + $0x28] sm:$0xff]  }
  0xb9   :  { %v1789_v47 = vsel %vm568_vm3, 1.0, %v2420_v40  ;;  %v1806_v48 = vsel %vm637_vm4, 1.0, %v2420_v40  ;;  %v1823_v49 = vsel %vm706_vm5, 1.0, %v2420_v40  ;;  %vm84_vm6 = vcmp.eq.s32.totalorder %v58_v43, %v2551_v29  ;;  %v2308_v52 = vld [vmem:[#allocation2 + $0x68] sm:$0xff]  }
  0xba   :  { %vm153_vm7 = vcmp.eq.s32.totalorder %v58_v43, %v2553_v30  ;;  %v1669_v50 = vsel %vm84_vm6, 1.0, %v2420_v40  ;;  %vm222_vm8 = vcmp.eq.s32.totalorder %v58_v43, %v2555_v31  ;;  %vm291_vm9 = vcmp.eq.s32.totalorder %v58_v43, %v2557_v32  ;;  %2146 = vmatprep.subr.bf16.mxu0 %v2308_v52  ;;  %v2324_v10 = vld [vmem:[#allocation2 + $0x48] sm:$0xff]  }
  0xbb   :  { %v1686_v51 = vsel %vm153_vm7, 1.0, %v2420_v40  ;;  %v1984_v54 = vpack.c.bf16 %v1670_v28, %v1669_v50  ;;  %v1703_v56 = vsel %vm222_vm8, 1.0, %v2420_v40  ;;  %v1720_v57 = vsel %vm291_vm9, 1.0, %v2420_v40  ;;  %2147 = vmatpush3.bf16.msra.mxu0 %v2310_v53  ;;  %v2311_v59 = vld [vmem:[#allocation2 + $0xa8] sm:$0xff]   ;;  %v2346_v28 = vld [vmem:[%s2875_s2 + $0x30] ss:$20 sps:$4 sm:$0xff]  }
  0xbc   :  { %v1996_v55 = vpack.c.bf16 %v1687_v37, %v1686_v51  ;;  %v2008_v58 = vpack.c.bf16 %v1704_v41, %v1703_v56  ;;  %v2020_v29 = vpack.c.bf16 %v1721_v42, %v1720_v57  ;;  %vm360_vm10 = vcmp.eq.s32.totalorder %v58_v43, %v2559_v33  ;;  %v2309_v30 = vld [vmem:[#allocation2 + $0xe8] sm:$0xff]   ;;  %v2352_v41 = vld [vmem:[%s2875_s2 + $0x5c] ss:$20 sps:$4 sm:$0xff]   ;;  %v2362_v51 = vld [vmem:[%s2875_s2 + $0x80] ss:$20 sps:$4 sm:$0xff]  }
  0xbd   :  { %vm429_vm11 = vcmp.eq.s32.totalorder %v58_v43, %v2561_v34  ;;  %1985 = vst [vmem:[#allocation2] sm:$0xff] %v1984_v54   ;;  %v1737_v31 = vsel %vm360_vm10, 1.0, %v2420_v40  ;;  %vm498_vm12 = vcmp.eq.s32.totalorder %v58_v43, %v2563_v35  ;;  %vm567_vm13 = vcmp.eq.s32.totalorder %v58_v43, %v2565_v36  ;;  %2186 = vmatprep.subr.bf16.mxu1 %v2309_v30  ;;  %v2325_v12 = vld [vmem:[#allocation2 + $0xc8] sm:$0xff]   ;;  %v2348_v42 = vld [vmem:[#allocation2 + $0x118] sm:$0xff]   ;;  %v2364_v50 = vld [vmem:[%s2875_s2 + $0x10] ss:$20 sps:$4 sm:$0xff]  }
  0xbe   :  { %2106 = vst [vmem:[#allocation2 + $0x20] sm:$0xff] %v1996_v55   ;;  %v1754_v32 = vsel %vm429_vm11, 1.0, %v2420_v40  ;;  %2110 = vst [vmem:[#allocation2 + $0x40] sm:$0xff] %v2008_v58   ;;  %v2032_v60 = vpack.c.bf16 %v1738_v44, %v1737_v31  ;;  %v1771_v34 = vsel %vm498_vm12, 1.0, %v2420_v40  ;;  %v1788_v61 = vsel %vm567_vm13, 1.0, %v2420_v40  ;;  %2187 = vmatpush3.bf16.msra.mxu1 %v2311_v59  ;;  %v2327_v15 = vld [vmem:[#allocation2 + $0x88] sm:$0xff]  }
  0xbf   :  { %2114 = vst [vmem:[#allocation2 + $0x60] sm:$0xff] %v2020_v29   ;;  %v2044_v33 = vpack.c.bf16 %v1755_v45, %v1754_v32  ;;  %v2056_v62 = vpack.c.bf16 %v1772_v46, %v1771_v34  ;;  %v2068_v63 = vpack.c.bf16 %v1789_v47, %v1788_v61  ;;  %vm636_vm14 = vcmp.eq.s32.totalorder %v58_v43, %v2567_v38  ;;  %v2344_v24 = vld [vmem:[%s2875_s2 + $0x34] ss:$20 sps:$4 sm:$0xff]   ;;  %v2357_v44 = vld [vmem:[%s2875_s2 + $0x7c] ss:$20 sps:$4 sm:$0xff]   ;;  %v1468_v56 = vld [vmem:[%s2877_s4] sm:$0xff] }
  0xc0   :  { %vm705_vm15 = vcmp.eq.s32.totalorder %v58_v43, %v2573_v39  ;;  %2118 = vst [vmem:[#allocation2 + $0x80] sm:$0xff] %v2032_v60   ;;  %v1805_v35 = vsel %vm636_vm14, 1.0, %v2420_v40  ;;  %v2317_v39 = vld [vmem:[#allocation2 + $0xd8] sm:$0xff]   ;;  %v2340_v25 = vld [vmem:[#allocation2 + $0x128] sm:$0xff]   ;;  %v2351_v43 = vld [vmem:[%s2875_s2 + $0x50] ss:$20 sps:$4 sm:$0xff]  }
  0xc1   :  { %2122 = vst [vmem:[#allocation2 + $0xa0] sm:$0xff] %v2044_v33   ;;  %v1822_v36 = vsel %vm705_vm15, 1.0, %v2420_v40  ;;  %2126 = vst [vmem:[#allocation2 + $0xc0] sm:$0xff] %v2056_v62   ;;  %v2080_v0 = vpack.c.bf16 %v1806_v48, %v1805_v35  ;;  %v2319_v40 = vld [vmem:[#allocation2 + $0x98] sm:$0xff]   ;;  %v2349_v27 = vld [vmem:[%s2875_s2 + $0x54] ss:$20 sps:$4 sm:$0xff]  }
  0xc2   :  { %2130 = vst [vmem:[#allocation2 + $0xe0] sm:$0xff] %v2068_v63   ;;  %v2092_v1 = vpack.c.bf16 %v1823_v49, %v1822_v36  ;;  %v2354_v45 = vld [vmem:[%s2875_s2 + $0x58] ss:$20 sps:$4 sm:$0xff]   ;;  %v2355_v46 = vld [vmem:[#allocation2 + $0x110] sm:$0xff]   ;;  %v2367_v55 = vld [vmem:[%s2875_s2 + $0x88] ss:$20 sps:$4 sm:$0xff]  }
  0xc3   :  { %2134 = vst [vmem:[#allocation2 + $0x100] sm:$0xff] %v2080_v0   ;;  %v2360_v47 = vld [vmem:[%s2875_s2 + $0x84] ss:$20 sps:$4 sm:$0xff]   ;;  %v2356_v48 = vld [vmem:[#allocation2 + $0x108] sm:$0xff]   ;;  %v2366_v54 = vld [vmem:[%s2875_s2 + $0x60] ss:$20 sps:$4 sm:$0xff]  }
  0xc4   :  { %2138 = vst [vmem:[#allocation2 + $0x120] sm:$0xff] %v2092_v1   ;;  %v2330_v17 = vld [vmem:[#allocation2] sm:$0xff]   ;;  %v2359_v49 = vld [vmem:[%s2875_s2 + $0x78] ss:$20 sps:$4 sm:$0xff]   ;;  %vm1496_vm0 = vcmask 523264  }
  0xc5   :  { %v2314_v3 = vld [vmem:[#allocation2 + $0x20] sm:$0xff]   ;;  %v2365_v53 = vld [vmem:[%s2875_s2 + $0x38] ss:$20 sps:$4 sm:$0xff]  }
  0xc6   :  { %v2312_v2 = vld [vmem:[#allocation2 + $0x60] sm:$0xff]  }
  0xc7   :  { %2148 = vmatprep.subr.bf16.mxu0 %v2312_v2  ;;  %v2328_v14 = vld [vmem:[#allocation2 + $0x40] sm:$0xff]  }
  0xc8   :  { %2149 = vmatpush3.bf16.msra.mxu0 %v2314_v3  ;;  %v2315_v5 = vld [vmem:[#allocation2 + $0xa0] sm:$0xff]  }
  0xc9   :  { %v2313_v38 = vld [vmem:[#allocation2 + $0xe0] sm:$0xff]   ;;  %2150 = vmatprep.subr.bf16.mxu0 %v2316_v4 }
  0xca   :  { %2188 = vmatprep.subr.bf16.mxu1 %v2313_v38  ;;  %v2329_v16 = vld [vmem:[#allocation2 + $0xc0] sm:$0xff]  }
  0xcb   :  { %2189 = vmatpush3.bf16.msra.mxu1 %v2315_v5  ;;  %v2331_v21 = vld [vmem:[#allocation2 + $0x80] sm:$0xff]  }
  0xcc   :  { %2190 = vmatprep.subr.bf16.mxu1 %v2317_v39  ;;  %2151 = vmatpush3.bf16.msra.mxu0 %v2318_v6  ;;  %v2347_v37 = vld [vmem:[#allocation2 + $0x120] sm:$0xff]  }
  0xcd   :  { %2152 = vmatprep.subr.bf16.mxu0 %v2320_v7  ;;  %v2363_v52 = vld [vmem:[#allocation2 + $0x100] sm:$0xff]  }
  0xcf   :  { %2191 = vmatpush3.bf16.msra.mxu1 %v2319_v40 }
  0xd0   :  { %2192 = vmatprep.subr.bf16.mxu1 %v2321_v8  ;;  %2153 = vmatpush3.bf16.msra.mxu0 %v2322_v9 }
  0xd1   :  { %2154 = vmatprep.subr.bf16.mxu0 %v2324_v10  ;;  %v919_v10 = vpop.permute.xlu0 %918 }
  0xd3   :  { %2193 = vmatpush3.bf16.msra.mxu1 %v2323_v11 }
  0xd4   :  { %2194 = vmatprep.subr.bf16.mxu1 %v2325_v12  ;;  %2155 = vmatpush3.bf16.msra.mxu0 %v2326_v13  ;;  %v914_v13 = vpop.permute.xlu1 %913 }
  0xd5   :  { %2156 = vmatprep.subr.bf16.mxu0 %v2328_v14 }
  0xd7   :  { %2195 = vmatpush3.bf16.msra.mxu1 %v2327_v15 }
  0xd8   :  { %2196 = vmatprep.subr.bf16.mxu1 %v2329_v16  ;;  %2157 = vmatpush3.bf16.msra.mxu0 %v2330_v17  ;;  %v909_v17 = vpop.permute.xlu0 %908 }
  0xd9   :  { %2246 = vmatprep.subr.bf16.mxu0 %v2332_v18 }
  0xdb   :  { %2197 = vmatpush3.bf16.msra.mxu1 %v2331_v21  ;;  %1298 = vmatmul.mubr.bf16.vlgmr.msra.gmra.mxu0 %v2333_v19 }
  0xdc   :  { %2247 = vmatpush3.bf16.msra.mxu0 %v2332_v18  ;;  %1305 = vmatprep.mubr.bf16.mxu0 %v2341_v20 }
  0xdd   :  { %2248 = vmatprep.subr.bf16.mxu0 %v2339_v23 }
  0xde   :  { %1363 = vmatmul.mubr.bf16.vlgmr.msra.gmra.mxu1 %v2336_v22  ;;  %v904_v22 = vpop.permute.xlu1 %903 }
  0xdf   :  { %1370 = vmatprep.mubr.bf16.mxu1 %v2344_v24 }
  0xe0   :  { %2249 = vmatpush3.bf16.msra.mxu0 %v2339_v23 }
  0xe1   :  { %2250 = vmatprep.subr.bf16.mxu0 %v2340_v25 }
  0xe3   :  { %1306 = vmatmul.mubr.bf16.gmra.mxu0 %v2343_v26 }
  0xe4   :  { %2251 = vmatpush3.bf16.msra.mxu0 %v2340_v25  ;;  %1313 = vmatprep.mubr.bf16.mxu0 %v2349_v27 }
  0xe5   :  { %2252 = vmatprep.subr.bf16.mxu0 %v2347_v37 }
  0xe6   :  { %1371 = vmatmul.mubr.bf16.gmra.mxu1 %v2346_v28 }
  0xe7   :  { %1378 = vmatprep.mubr.bf16.mxu1 %v2352_v41 }
  0xe8   :  { %2253 = vmatpush3.bf16.msra.mxu0 %v2347_v37 }
  0xe9   :  { %2254 = vmatprep.subr.bf16.mxu0 %v2348_v42 }
  0xeb   :  { %1314 = vmatmul.mubr.bf16.gmra.mxu0 %v2351_v43  ;;  %v899_v43 = vpop.permute.xlu0 %898 }
  0xec   :  { %2255 = vmatpush3.bf16.msra.mxu0 %v2348_v42  ;;  %1321 = vmatprep.mubr.bf16.mxu0 %v2357_v44 }
  0xed   :  { %2256 = vmatprep.subr.bf16.mxu0 %v2355_v46 }
  0xee   :  { %1379 = vmatmul.mubr.bf16.gmra.mxu1 %v2354_v45 }
  0xef   :  { %1386 = vmatprep.mubr.bf16.mxu1 %v2360_v47 }
  0xf0   :  { %2257 = vmatpush3.bf16.msra.mxu0 %v2355_v46 }
  0xf1   :  { %2258 = vmatprep.subr.bf16.mxu0 %v2356_v48 }
  0xf3   :  { %1322 = vmatmul.mubr.bf16.gmra.mxu0 %v2359_v49 }
  0xf4   :  { %2259 = vmatpush3.bf16.msra.mxu0 %v2356_v48  ;;  %2262 = vmatprep.mubr.bf16.mxu0 %v2364_v50  ;;  %v894_v48 = vpop.permute.xlu1 %893 }
  0xf5   :  { %2260 = vmatprep.subr.bf16.mxu0 %v2363_v52 }
  0xf6   :  { %1387 = vmatmul.mubr.bf16.gmra.mxu1 %v2362_v51 }
  0xf7   :  { %2286 = vmatprep.mubr.msk.f32.mxu1 %vm1496_vm0, %v1468_v56 }
  0xf8   :  { %2261 = vmatpush3.bf16.msra.mxu0 %v2363_v52 }
  0xfb   :  { %2263 = vmatmul.mubr.bf16.vlgmr.msra.gmra.mxu0 %v2365_v53 }
  0xfc   :  { %2266 = vmatprep.mubr.bf16.mxu0 %v2366_v54 }
 0x103   :  { %2267 = vmatmul.mubr.bf16.gmra.mxu0 %v2367_v55 }
 0x19b   :  { %v2837_v57 = vpop.f32.mrf.mxu0 }
 0x19d   :  { %v2839_v58 = vpop.f32.mrf.mxu0 }
 0x19e   :  { %v2841_v29 = vpop.f32.mrf.mxu1 }
 0x19f   :  { %v2161_v30 = vpop.f32.mrf.mxu0 }
 0x1a0   :  { %v2843_v31 = vpop.f32.mrf.mxu1 }
 0x1a1   :  { %v2162_v32 = vpop.f32.mrf.mxu0 }
 0x1a2   :  { %v2845_v59 = vpop.f32.mrf.mxu1  ;;  %v2163_v53 = vadd.f32 %v2162_v32, %v2161_v30 }
 0x1a3   :  { %v2164_v60 = vpop.f32.mrf.mxu0 }
 0x1a4   :  { %v2847_v33 = vpop.f32.mrf.mxu1 }
 0x1a5   :  { %v2165_v34 = vpop.f32.mrf.mxu0  ;;  %v2203_v30 = vadd.f32 %v2847_v33, %v2845_v59 }
 0x1a6   :  { %v2204_v61 = vpop.f32.mrf.mxu1  ;;  %v2166_v46 = vadd.f32 %v2165_v34, %v2164_v60 }
 0x1a7   :  { %v2167_v62 = vpop.f32.mrf.mxu0 }
 0x1a8   :  { %v2205_v63 = vpop.f32.mrf.mxu1 }
 0x1a9   :  { %v2168_v35 = vpop.f32.mrf.mxu0  ;;  %v2206_v60 = vadd.f32 %v2205_v63, %v2204_v61 }
 0x1aa   :  { %v2207_v36 = vpop.f32.mrf.mxu1  ;;  %v2169_v41 = vadd.f32 %v2168_v35, %v2167_v62  ;;  %v2160_v62 = vadd.f32 %v2839_v58, %v2837_v57  ;;  %v1308_v35 = vadd.f32 %v2166_v46, %v894_v48  ;;  %v2200_v57 = vadd.f32 %v2843_v31, %v2841_v29 }
 0x1ab   :  { %v2170_v0 = vpop.f32.mrf.mxu0 }
 0x1ac   :  { %v2208_v1 = vpop.f32.mrf.mxu1  ;;  %v1311_v54 = vadd.f32 %v2169_v41, %v899_v43  ;;  %v1373_v58 = vadd.f32 %v2206_v60, %v1308_v35 }
 0x1ad   :  { %v2171_v2 = vpop.f32.mrf.mxu0  ;;  %v2209_v56 = vadd.f32 %v2208_v1, %v2207_v36 }
 0x1ae   :  { %v2210_v3 = vpop.f32.mrf.mxu1  ;;  %v2172_v24 = vadd.f32 %v2171_v2, %v2170_v0 }
 0x1af   :  { %v2173_v4 = vpop.f32.mrf.mxu0  ;;  %v1376_v32 = vadd.f32 %v2209_v56, %v1311_v54  ;;  %v1641_v54 = vlaneseq }
 0x1b0   :  { %v2211_v38 = vpop.f32.mrf.mxu1  ;;  %v1316_v49 = vadd.f32 %v2172_v24, %v904_v22 }
 0x1b1   :  { %v2174_v39 = vpop.f32.mrf.mxu0  ;;  %v2212_v50 = vadd.f32 %v2211_v38, %v2210_v3  ;;  %v884_v38 = vpop.permute.xlu1 %883 }
 0x1b2   :  { %v2213_v5 = vpop.f32.mrf.mxu1  ;;  %v2175_v23 = vadd.f32 %v2174_v39, %v2173_v4 }
 0x1b3   :  { %v2176_v6 = vpop.f32.mrf.mxu0  ;;  %v1381_v34 = vadd.f32 %v2212_v50, %v1316_v49 }
 0x1b4   :  { %v2214_v7 = vpop.f32.mrf.mxu1  ;;  %v1319_v44 = vadd.f32 %v2175_v23, %v909_v17 }
 0x1b5   :  { %v2177_v40 = vpop.f32.mrf.mxu0  ;;  %v2215_v45 = vadd.f32 %v2214_v7, %v2213_v5  ;;  %v889_v5 = vpop.permute.xlu0 %888 }
 0x1b6   :  { %v2216_v8 = vpop.f32.mrf.mxu1  ;;  %v2178_v18 = vadd.f32 %v2177_v40, %v2176_v6  ;;  %v1303_v3 = vadd.f32 %v2163_v53, %v889_v5  ;;  %v1300_v40 = vadd.f32 %v2160_v62, %v884_v38 }
 0x1b7   :  { %v2179_v9 = vpop.f32.mrf.mxu0  ;;  %v1384_v4 = vadd.f32 %v2215_v45, %v1319_v44 }
 0x1b8   :  { %v2217_v11 = vpop.f32.mrf.mxu1  ;;  %v1324_v26 = vadd.f32 %v2178_v18, %v914_v13  ;;  %v1365_v59 = vadd.f32 %v2200_v57, %v1300_v40  ;;  %v1484_v18 = vpop.permute.xlu1 %1483 }
 0x1b9   :  { %v2180_v12 = vpop.f32.mrf.mxu0  ;;  %v2218_v27 = vadd.f32 %v2217_v11, %v2216_v8  ;;  %v1479_v17 = vpop.permute.xlu0 %1478 }
 0x1ba   :  { %v2219_v14 = vpop.f32.mrf.mxu1  ;;  %v2181_v19 = vadd.f32 %v2180_v12, %v2179_v9  ;;  %v1368_v9 = vadd.f32 %v2203_v30, %v1303_v3 }
 0x1bb   :  { %v2264_v15 = vpop.f32.mrf.mxu0  ;;  %v1389_v51 = vadd.f32 %v2218_v27, %v1324_v26 }
 0x1bc   :  { %v2220_v20 = vpop.f32.mrf.mxu1  ;;  %v1327_v28 = vadd.f32 %v2181_v19, %v919_v10  ;;  %v1438_v63 = vadd.f32 %v2264_v15, %v1373_v58  ;;  %v1470_v15 = vld [vmem:[%s2877_s4 + $0x10] sm:$0xff] }
 0x1bd   :  { %v2849_v16 = vpop.f32.mrf.mxu0  ;;  %v2221_v37 = vadd.f32 %v2220_v20, %v2219_v14  ;;  %v1469_v14 = vld [vmem:[%s2877_s4 + $0x8] sm:$0xff]  ;;  %v1489_v19 = vpop.permute.xlu0 %1488 }
 0x1be   :  { %v1462_v12 = vmax.f32 %v1438_v63, 0.0  ;;  %v1430_v13 = vadd.f32 %v2849_v16, %v1365_v59  ;;  %v1471_v16 = vld [vmem:[%s2877_s4 + $0x18] sm:$0xff]  ;;  %v1494_v20 = vpop.permute.xlu1 %1493  ;;  %s2421_s4 = smov [#allocation7]  }
 0x1bf   :  { %v2265_v21 = vpop.f32.mrf.mxu0  ;;  %v1392_v52 = vadd.f32 %v2221_v37, %v1327_v28  ;;  %s1659_s26 = sshll.u32 %s2421_s4, 4  ;;  %s1660_s26 = int_to_ptr.vmem [resolvable:$true] %s1659_s26 }
 0x1c0   :  { %v1441_v8 = vadd.f32 %v2265_v21, %v1376_v32  ;;  %v1460_v31 = vmax.f32 %v1430_v13, 0.0  ;;  %s2392_s3 = scalar_lea.vmem %s1660_s26, 16  ;;  %s2396_s27 = scalar_lea.vmem %s1660_s26, 32 }
 0x1c1   :  { %v1432_v25 = vpop.f32.mrf.mxu0  ;;  %p2393_p5 = scmp.ne.s32.totalorder %s1660_s26, %s2392_s3  ;;  %p2397_p6 = scmp.lt.s32.totalorder %s1660_s26, %s1660_s26 }
 0x1c2   :  { %v1463_v33 = vmax.f32 %v1441_v8, 0.0  ;;  %v1433_v11 = vadd.f32 %v1432_v25, %v1368_v9  ;;  %v1605_v25 = vpop.permute.xlu0 %1604  ;;  %v1610_v41 = vpop.permute.xlu1 %1609  ;;  %p2398_p7 = scmp.lt.s32.totalorder %s2396_s27, %s2392_s3 }
 0x1c3   :  { %v2268_v42 = vpop.f32.mrf.mxu0 }
 0x1c4   :  { %v1454_v0 = vadd.f32 %v2268_v42, %v1389_v51  ;;  %v1461_v29 = vmax.f32 %v1433_v11, 0.0  ;;  %p2399_p8 = por %p2398_p7, %p2397_p6 }
 0x1c5   :  { %v1445_v47 = vpop.f32.mrf.mxu0 }
 0x1c6   :  { %v1466_v36 = vmax.f32 %v1454_v0, 0.0  ;;  %v1446_v1 = vadd.f32 %v1445_v47, %v1381_v34  ;;  %v1615_v48 = vpop.permute.xlu0 %1614  ;;  %v1620_v51 = vpop.permute.xlu1 %1619  ;;  %v1642_v0 = vshrl.u32 %v1641_v54, 7  ;;  %p2400_p9 = pnand %p2399_p8, %p2393_p5 }
 0x1c7   :  { %v2269_v55 = vpop.f32.mrf.mxu0 }
 0x1c8   :  { %v1457_v2 = vadd.f32 %v2269_v55, %v1392_v52  ;;  %v1464_v10 = vmax.f32 %v1446_v1, 0.0  ;;  %v1643_v62 = vsub.s32 0, %v1642_v0 }
 0x1c9   :  { %v1448_v39 = vpop.f32.mrf.mxu0 }
 0x1ca   :  { %v1467_v6 = vmax.f32 %v1457_v2, 0.0  ;;  %v1449_v7 = vadd.f32 %v1448_v39, %v1384_v4  ;;  %v1639_v39 = vpop.permute.xlu0 %1638 }
 0x1cb   :  { %v1644_v60 = vrot.slane %v1639_v39, %v1643_v62 }
 0x1cc   :  { %2270 = vmatprep.subr.mxu1 %v1467_v6  ;;  %v1465_v61 = vmax.f32 %v1449_v7, 0.0 }
 0x1cd   :  { %2271 = vmatpush3.msra.mxu1 %v1467_v6 }
 0x1ce   :  { %2272 = vmatprep.subr.mxu1 %v1466_v36 }
 0x1cf   :  { %2273 = vmatpush3.msra.mxu1 %v1466_v36 }
 0x1d0   :  { %2274 = vmatprep.subr.mxu1 %v1465_v61 }
 0x1d1   :  { %2275 = vmatpush3.msra.mxu1 %v1465_v61 }
 0x1d2   :  { %2276 = vmatprep.subr.mxu1 %v1464_v10 }
 0x1d3   :  { %2277 = vmatpush3.msra.mxu1 %v1464_v10 }
 0x1d4   :  { %2278 = vmatprep.subr.mxu1 %v1463_v33 }
 0x1d5   :  { %2279 = vmatpush3.msra.mxu1 %v1463_v33 }
 0x1d6   :  { %2280 = vmatprep.subr.mxu1 %v1462_v12 }
 0x1d7   :  { %2281 = vmatpush3.msra.mxu1 %v1462_v12 }
 0x1d8   :  { %2282 = vmatprep.subr.mxu1 %v1461_v29 }
 0x1d9   :  { %2283 = vmatpush3.msra.mxu1 %v1461_v29 }
 0x1da   :  { %2284 = vmatprep.subr.mxu1 %v1460_v31 }
 0x1db   :  { %2285 = vmatpush3.msra.mxu1 %v1460_v31 }
 0x1dc   :  { %2287 = vmatmul.mubr.msk.f32.vlgmr.msra.gmra.mxu1 %vm1496_vm0, %v1469_v14 }
 0x1dd   :  { %2289 = vmatprep.mubr.msk.f32.mxu1 %vm1496_vm0, %v1470_v15 }
 0x1e0   :  { %2290 = vmatmul.mubr.msk.f32.gmra.mxu1 %vm1496_vm0, %v1471_v16 }
 0x29c   :  { %v2288_v21 = vpop.f32.mrf.mxu1 }
 0x29d   :  { %v1581_v22 = vadd.f32 %v2288_v21, %v1484_v18 }
 0x29e   :  { %v1575_v23 = vpop.f32.mrf.mxu1 }
 0x29f   :  { %v1576_v24 = vadd.f32 %v1575_v23, %v1479_v17  ;;  %v1595_v27 = vmax.f32 %v1581_v22, 0.0 }
 0x2a0   :  { %v2291_v26 = vpop.f32.mrf.mxu1 }
 0x2a1   :  { %v1594_v28 = vmax.f32 %v1576_v24, 0.0  ;;  %v1591_v37 = vadd.f32 %v2291_v26, %v1494_v20  ;;  %v1623_v45 = vmul.f32 %v1610_v41, %v1595_v27 }
 0x2a2   :  { %v1585_v42 = vpop.f32.mrf.mxu1 }
 0x2a3   :  { %v1622_v43 = vmul.f32 %v1605_v25, %v1594_v28  ;;  %v1586_v44 = vadd.f32 %v1585_v42, %v1489_v19  ;;  %v1597_v46 = vmax.f32 %v1591_v37, 0.0 }
 0x2a5   :  { %v1596_v47 = vmax.f32 %v1586_v44, 0.0  ;;  %v1626_v49 = vadd.f32 %v1623_v45, %v1622_v43  ;;  %v1625_v52 = vmul.f32 %v1620_v51, %v1597_v46 }
 0x2a7   :  { %v1624_v50 = vmul.f32 %v1615_v48, %v1596_v47 }
 0x2a9   :  { %v1627_v53 = vadd.f32 %v1626_v49, %v1624_v50 }
 0x2ab   :  { %v1628_v55 = vadd.f32 %v1627_v53, %v1625_v52 }
 0x2ad   :  { %v1629_v56 = vrot.slane %v1628_v55, 4 }
 0x2af   :  { %v1630_v2 = vadd.f32 %v1629_v56, %v1628_v55 }
 0x2b1   :  { %v1631_v4 = vrot.slane %v1630_v2, 2 }
 0x2b3   :  { %v1632_v35 = vadd.f32 %v1631_v4, %v1630_v2 }
 0x2b5   :  { %v1633_v5 = vrot.slane %v1632_v35, 1 }
 0x2b7   :  { %v1634_v34 = vadd.f32 %v1633_v5, %v1632_v35 }
 0x2b9   :  { %v1645_v6 = vadd.f32 %v1644_v60, %v1634_v34 }
 0x2bb   :  { %v1902_v7 = vmul.f32 -1.442695, %v1645_v6 }
 0x2bd   :  { %2368 = vpow2.f32 %v1902_v7 }
 0x2ca   :  { %v2369_v3 = vpop.eup %2368 }
 0x2cb   :  { %v1649_v38 = vadd.f32 1.0, %v2369_v3 }
 0x2cd   :  { %2370 = vrcp.f32 %v1649_v38 }
 0x2da   :  { %v2371_v30 = vpop.eup %2370 }
 0x2db   :  { %1652 = vst [vmem:[#allocation7] sm:$0x1] %v2371_v30 }
 0x2dc   :  { %2403 = shalt.err (!%p2400_p9)
}
 0x2dd   :  { %1662 = dma.vmem_to_hbm [thread:$0]  %s1660_s26, 16, %s2881_s8, [#allocation6]  }
 0x2de   :  { %2414 = dma.done.wait [#allocation6], 16  }
 0x2df   :  { %2415 = vsyncadd [#allocation6], 4294967280 }
 0x2e0   :  { %1666 = vsyncpa [#allocation5], 1 }
 0x2e1   :  { %1667 = vsyncpa [#allocation6], 1 }

</bundles_post_ra>
